<compile_context>
chip_gen: v6e
topology: v6e:2x2x1
jax: 0.10.0
libtpu: 0.0.40
codegen_flags: <defaults>
</compile_context>

<pallas_src>
import jax
import jax.numpy as jnp
from jax.experimental import pallas as pl
from jax.experimental.pallas import tpu as pltpu


def _round_up(x: int, m: int) -> int:
    return (x + m - 1) // m * m


def _maybe_pad2d(a, rows, cols):
    """Zero-pad a 2-D array only if it is actually unaligned (avoids HBM copies)."""
    pr, pc = rows - a.shape[0], cols - a.shape[1]
    if pr == 0 and pc == 0:
        return a
    return jnp.pad(a, ((0, pr), (0, pc)))


def _vmem_capacity_bytes() -> int:
    try:
        info = pltpu.get_tpu_info()
        cap = getattr(info, "vmem_capacity_bytes", None)
        if cap:
            return int(cap)
    except Exception:
        pass
    return 64 << 20  # conservative: v7x per-TensorCore VMEM


# ----------------------------------------------------------------------------
# Kernels
# ----------------------------------------------------------------------------
def ffn_resident_kernel(x_ref, w1_ref, b1_ref, w2_ref, b2_ref, o_ref):
    # Weights are VMEM-resident (constant index_map); grid is 1-D over row tiles.
    h = jnp.dot(x_ref[...], w1_ref[...], preferred_element_type=jnp.float32)
    h = jnp.maximum(h + b1_ref[...].astype(jnp.float32), 0.0)
    out = jnp.dot(h.astype(w2_ref.dtype), w2_ref[...],
                  preferred_element_type=jnp.float32)
    o_ref[...] = (out + b2_ref[...].astype(jnp.float32)).astype(o_ref.dtype)


def ffn_stream_kernel(x_ref, w1_ref, b1_ref, w2_ref, b2_ref, o_ref, *scratch):
    # d_ff streamed in chunks along grid axis 1; accumulator is either the f32
    # output block itself (resident across the reduction axis) or an f32 scratch.
    acc_ref = scratch[0] if scratch else o_ref
    k = pl.program_id(1)

    @pl.when(k == 0)
    def _():
        acc_ref[...] = jnp.zeros_like(acc_ref)

    h = jnp.dot(x_ref[...], w1_ref[...], preferred_element_type=jnp.float32)
    h = jnp.maximum(h + b1_ref[...].astype(jnp.float32), 0.0)
    acc_ref[...] += jnp.dot(h.astype(w2_ref.dtype), w2_ref[...],
                            preferred_element_type=jnp.float32)

    @pl.when(k == pl.num_programs(1) - 1)
    def _():
        o_ref[...] = (acc_ref[...] + b2_ref[...].astype(jnp.float32)
                      ).astype(o_ref.dtype)


# ----------------------------------------------------------------------------
# Wrapper
# ----------------------------------------------------------------------------
def positionwise_ffn(x, w1, b1, w2, b2, *, tm=None, tf=512, force_stream=False):
    """x: (batch, seq, d_model). w1: (d_model, d_ff), w2: (d_ff, d_model).

    Returns (batch, seq, d_model).  Dropout is identity (inference semantics).
    """
    B, S, D = x.shape
    d_ff = w1.shape[1]
    dtype = x.dtype
    itemsize = jnp.dtype(dtype).itemsize
    sub = {4: 8, 2: 16, 1: 32}.get(itemsize, 8)

    M = B * S
    x2d = x.reshape(M, D)

    Dp = _round_up(D, 128)
    Fp_full = _round_up(d_ff, 128)

    vmem_cap = _vmem_capacity_bytes()
    vmem_budget = int(vmem_cap * 0.75)

    def row_tiles(tm_req):
        if M <= tm_req:
            tm_e = _round_up(max(M, 1), sub)
        else:
            tm_e = _round_up(tm_req, sub)
        mp = _round_up(M, tm_e)
        # Guarantee >= 2 row tiles when there is enough work so that the
        # "parallel" axis actually feeds both TensorCores on multi-core chips.
        if mp // tm_e < 2 and M >= 2 * 256:
            tm_e = _round_up((M + 1) // 2, sub)
            mp = _round_up(M, tm_e)
        return tm_e, mp

    # ----- weight-resident fast path decision --------------------------------
    def resident_footprint(tm_r):
        return (
            2 * tm_r * Dp * itemsize            # x tiles (double-buffered)
            + 2 * tm_r * Dp * itemsize          # out tiles
            + 2 * Dp * Fp_full * itemsize       # W1 (conservatively 2 buffers)
            + 2 * Fp_full * Dp * itemsize       # W2
            + 2 * (Fp_full + Dp) * itemsize     # biases
            + 2 * tm_r * Fp_full * 4            # f32 intermediate h (+ cast copy)
            + tm_r * Dp * 4                     # f32 matmul result before cast
        )

    tm_resident = int(tm) if tm is not None else 256
    use_resident = (not force_stream) and (
        resident_footprint(tm_resident) <= vmem_budget)

    if use_resident:
        Fp = Fp_full
        tm_eff, Mp = row_tiles(tm_resident)
        footprint = resident_footprint(tm_eff)
        grid = (Mp // tm_eff,)
        in_specs = [
            pl.BlockSpec((tm_eff, Dp), lambda i: (i, 0)),   # x row tile
            pl.BlockSpec((Dp, Fp), lambda i: (0, 0)),        # W1 (resident)
            pl.BlockSpec((1, Fp), lambda i: (0, 0)),          # b1 (resident)
            pl.BlockSpec((Fp, Dp), lambda i: (0, 0)),         # W2 (resident)
            pl.BlockSpec((1, Dp), lambda i: (0, 0)),          # b2 (resident)
        ]
        out_specs = pl.BlockSpec((tm_eff, Dp), lambda i: (i, 0))
        scratch_shapes = []
        kernel = ffn_resident_kernel
        dim_sem = ("parallel",)
        bytes_accessed = (
            Mp * Dp * itemsize                               # read x once
            + (2 * Dp * Fp + Fp + Dp) * itemsize             # weights once
            + Mp * Dp * itemsize                             # write out
        )
    else:
        # ----- streamed-weight path: big row tile, d_ff chunked --------------
        if tm is not None:
            tm_req = int(tm)
        else:
            tm_req = 1024 if vmem_cap >= (96 << 20) else 512
        tm_eff, Mp = row_tiles(tm_req)

        use_out_acc = (dtype == jnp.float32)

        def stream_footprint(tm_e, tf_e):
            acc = 0 if use_out_acc else tm_e * Dp * 4
            return (
                2 * tm_e * Dp * itemsize        # x tiles
                + 2 * tm_e * Dp * itemsize      # out tiles
                + 2 * Dp * tf_e * itemsize      # W1 chunks
                + 2 * tf_e * Dp * itemsize      # W2 chunks
                + 2 * (tf_e + Dp) * itemsize    # biases
                + 2 * tm_e * tf_e * 4           # f32 intermediate h (+ cast copy)
                + acc                           # f32 accumulator (if any)
            )

        tf_eff = _round_up(min(int(tf), Fp_full), 128)
        while stream_footprint(tm_eff, tf_eff) > vmem_budget:
            new_tf = max(128, (tf_eff // 2) // 128 * 128)
            if new_tf == tf_eff:
                break
            tf_eff = new_tf
        while stream_footprint(tm_eff, tf_eff) > vmem_budget and tm_eff > 8 * sub:
            tm_eff = max(sub, _round_up(tm_eff // 2, sub))
            Mp = _round_up(M, tm_eff)

        Fp = _round_up(d_ff, tf_eff)
        footprint = stream_footprint(tm_eff, tf_eff)
        grid = (Mp // tm_eff, Fp // tf_eff)
        in_specs = [
            pl.BlockSpec((tm_eff, Dp), lambda i, k: (i, 0)),   # x row tile
            pl.BlockSpec((Dp, tf_eff), lambda i, k: (0, k)),    # W1 chunk
            pl.BlockSpec((1, tf_eff), lambda i, k: (0, k)),     # b1 chunk
            pl.BlockSpec((tf_eff, Dp), lambda i, k: (k, 0)),    # W2 chunk
            pl.BlockSpec((1, Dp), lambda i, k: (0, 0)),          # b2
        ]
        out_specs = pl.BlockSpec((tm_eff, Dp), lambda i, k: (i, 0))
        scratch_shapes = ([] if use_out_acc
                          else [pltpu.VMEM((tm_eff, Dp), jnp.float32)])
        kernel = ffn_stream_kernel
        dim_sem = ("parallel", "arbitrary")
        bytes_accessed = (
            Mp * Dp * itemsize                                  # read x once
            + grid[0] * (2 * Dp * Fp + Fp + Dp) * itemsize       # weights per row tile
            + Mp * Dp * itemsize                                  # write out
        )

    # Zero-pad only when actually unaligned (zeros are neutral through
    # matmul + ReLU; padded rows/cols are sliced away afterwards).
    xp = _maybe_pad2d(x2d, Mp, Dp)
    w1p = _maybe_pad2d(w1, Dp, Fp)
    b1p = _maybe_pad2d(b1.reshape(1, -1), 1, Fp)
    w2p = _maybe_pad2d(w2, Fp, Dp)
    b2p = _maybe_pad2d(b2.reshape(1, -1), 1, Dp)

    vmem_limit = int(min(vmem_cap,
                         max(int(footprint * 1.25) + (4 << 20), 16 << 20)))

    cost = pl.CostEstimate(
        flops=4 * Mp * Dp * Fp,
        transcendentals=0,
        bytes_accessed=int(bytes_accessed),
    )

    out2d = pl.pallas_call(
        kernel,
        out_shape=jax.ShapeDtypeStruct((Mp, Dp), dtype),
        grid_spec=pltpu.PrefetchScalarGridSpec(
            num_scalar_prefetch=0,
            grid=grid,
            in_specs=in_specs,
            out_specs=out_specs,
            scratch_shapes=scratch_shapes,
        ),
        compiler_params=pltpu.CompilerParams(
            dimension_semantics=dim_sem,
            vmem_limit_bytes=vmem_limit,
        ),
        cost_estimate=cost,
    )(xp, w1p, b1p, w2p, b2p)

    if Mp != M or Dp != D:
        out2d = out2d[:M, :D]
    return out2d.reshape(B, S, D)


# ----------------------------------------------------------------------------
# Init + reference + tests
# ----------------------------------------------------------------------------
def init_params(key, d_model, d_ff, dtype=jnp.float32):
    """Deterministic init mimicking nn.Linear's U(-1/sqrt(fan_in), 1/sqrt(fan_in))."""
    k1, k2, k3, k4 = jax.random.split(key, 4)
    bound1 = 1.0 / (d_model ** 0.5)
    bound2 = 1.0 / (d_ff ** 0.5)
    # Stored pre-transposed relative to PyTorch's (out, in) convention.
    w1 = jax.random.uniform(k1, (d_model, d_ff), dtype, -bound1, bound1)
    b1 = jax.random.uniform(k2, (1, d_ff), dtype, -bound1, bound1)
    w2 = jax.random.uniform(k3, (d_ff, d_model), dtype, -bound2, bound2)
    b2 = jax.random.uniform(k4, (1, d_model), dtype, -bound2, bound2)
    return w1, b1, w2, b2


def _reference(x, w1, b1, w2, b2):
    B, S, D = x.shape
    h = jnp.maximum(x.reshape(-1, D) @ w1 + b1, 0.0)
    return (h @ w2 + b2).reshape(B, S, D)


if __name__ == "__main__":
    key = jax.random.PRNGKey(0)

    # Test 1: small lane-aligned transformer dims -> weight-resident fast path.
    batch, seq, d_model, d_ff = 2, 8, 128, 256
    kx, kp, kx2, kp2 = jax.random.split(key, 4)
    x = jax.random.normal(kx, (batch, seq, d_model), jnp.float32)
    w1, b1, w2, b2 = init_params(kp, d_model, d_ff)

    out = positionwise_ffn(x, w1, b1, w2, b2)
    out = jax.block_until_ready(out)
    ref = _reference(x, w1, b1, w2, b2)
    assert jnp.allclose(out, ref, atol=1e-4, rtol=1e-4), \
        "mismatch vs reference (resident path)"

    # Test 2: non-128-aligned dims exercise the zero-padding path.
    d_model2, d_ff2 = 32, 64
    x2 = jax.random.normal(kx2, (batch, seq, d_model2), jnp.float32)
    w1b, b1b, w2b, b2b = init_params(kp2, d_model2, d_ff2)

    out2 = positionwise_ffn(x2, w1b, b1b, w2b, b2b)
    out2 = jax.block_until_ready(out2)
    ref2 = _reference(x2, w1b, b1b, w2b, b2b)
    assert jnp.allclose(out2, ref2, atol=1e-4, rtol=1e-4), \
        "mismatch vs reference (padded path)"

    # Test 3: force the streamed-weight path (d_ff chunked, output block used
    # as the f32 accumulator across the reduction axis).
    out3 = positionwise_ffn(x, w1, b1, w2, b2, tf=128, force_stream=True)
    out3 = jax.block_until_ready(out3)
    assert jnp.allclose(out3, ref, atol=1e-4, rtol=1e-4), \
        "mismatch vs reference (streamed path)"

    print("KERNEL_OK")
</pallas_src>

<mosaic_0001>
module attributes {stable_mosaic.version = 11 : i64} {
  func.func @ffn_resident_kernel(%arg0: i32, %arg1: memref<16x128xf32, #tpu.memory_space<vmem>>, %arg2: memref<128x256xf32, #tpu.memory_space<vmem>>, %arg3: memref<1x256xf32, #tpu.memory_space<vmem>>, %arg4: memref<256x128xf32, #tpu.memory_space<vmem>>, %arg5: memref<1x128xf32, #tpu.memory_space<vmem>>, %arg6: memref<16x128xf32, #tpu.memory_space<vmem>>) attributes {dimension_semantics = [#tpu.dimension_semantics<parallel>], iteration_bounds = array<i64: 1>, scalar_prefetch = 0 : i64, scratch_operands = 0 : i64, tpu.core_type = #tpu.core_type<tc>, window_params = [{transform_indices = @transform_0, window_bounds = array<i64: 16, 128>}, {pipeline_mode = #tpu.pipeline_mode<synchronous>, transform_indices = @transform_1, window_bounds = array<i64: 128, 256>}, {pipeline_mode = #tpu.pipeline_mode<synchronous>, transform_indices = @transform_2, window_bounds = array<i64: 1, 256>}, {pipeline_mode = #tpu.pipeline_mode<synchronous>, transform_indices = @transform_3, window_bounds = array<i64: 256, 128>}, {pipeline_mode = #tpu.pipeline_mode<synchronous>, transform_indices = @transform_4, window_bounds = array<i64: 1, 128>}, {transform_indices = @transform_5, window_bounds = array<i64: 16, 128>}]} {
    %c0 = arith.constant 0 : index
    %c0_0 = arith.constant 0 : index
    %0 = vector.load %arg1[%c0, %c0_0] : memref<16x128xf32, #tpu.memory_space<vmem>>, vector<16x128xf32>
    %c0_1 = arith.constant 0 : index
    %c0_2 = arith.constant 0 : index
    %1 = vector.load %arg2[%c0_1, %c0_2] : memref<128x256xf32, #tpu.memory_space<vmem>>, vector<128x256xf32>
    %cst = arith.constant dense<0.000000e+00> : vector<16x256xf32>
    %2 = tpu.matmul %0, %1, %cst {dimension_numbers = #tpu.dot_dimension_numbers<[1], [0], [0], [1], [0, 0, 1, 1], [], []>} : vector<16x128xf32>, vector<128x256xf32>, vector<16x256xf32> -> vector<16x256xf32>
    %c0_3 = arith.constant 0 : index
    %c0_4 = arith.constant 0 : index
    %3 = vector.load %arg3[%c0_3, %c0_4] : memref<1x256xf32, #tpu.memory_space<vmem>>, vector<1x256xf32>
    %4 = vector.broadcast %3 : vector<1x256xf32> to vector<16x256xf32>
    %5 = arith.addf %2, %4 : vector<16x256xf32>
    %cst_5 = arith.constant 0.000000e+00 : f32
    %6 = vector.broadcast %cst_5 : f32 to vector<16x256xf32>
    %7 = arith.maximumf %5, %6 : vector<16x256xf32>
    %c0_6 = arith.constant 0 : index
    %c0_7 = arith.constant 0 : index
    %8 = vector.load %arg4[%c0_6, %c0_7] : memref<256x128xf32, #tpu.memory_space<vmem>>, vector<256x128xf32>
    %cst_8 = arith.constant dense<0.000000e+00> : vector<16x128xf32>
    %9 = tpu.matmul %7, %8, %cst_8 {dimension_numbers = #tpu.dot_dimension_numbers<[1], [0], [0], [1], [0, 0, 1, 1], [], []>} : vector<16x256xf32>, vector<256x128xf32>, vector<16x128xf32> -> vector<16x128xf32>
    %c0_9 = arith.constant 0 : index
    %c0_10 = arith.constant 0 : index
    %10 = vector.load %arg5[%c0_9, %c0_10] : memref<1x128xf32, #tpu.memory_space<vmem>>, vector<1x128xf32>
    %11 = vector.broadcast %10 : vector<1x128xf32> to vector<16x128xf32>
    %12 = arith.addf %9, %11 : vector<16x128xf32>
    %c0_11 = arith.constant 0 : index
    %c0_12 = arith.constant 0 : index
    %13 = vector.load %arg6[%c0_11, %c0_12] : memref<16x128xf32, #tpu.memory_space<vmem>>, vector<16x128xf32>
    tpu.vector_store %arg6[%c0_11, %c0_12], %12 {strides = array<i32>} : memref<16x128xf32, #tpu.memory_space<vmem>>, vector<16x128xf32>,
    return
  }
  func.func @transform_0(%arg0: i32) -> (i32, i32) {
    %c0_i32 = arith.constant 0 : i32
    %c0_i32_0 = arith.constant 0 : i32
    return %arg0, %c0_i32 : i32, i32
  }
  func.func @transform_1(%arg0: i32) -> (i32, i32) {
    %c0_i32 = arith.constant 0 : i32
    %c0_i32_0 = arith.constant 0 : i32
    %c0_i32_1 = arith.constant 0 : i32
    return %c0_i32, %c0_i32_0 : i32, i32
  }
  func.func @transform_2(%arg0: i32) -> (i32, i32) {
    %c0_i32 = arith.constant 0 : i32
    %c0_i32_0 = arith.constant 0 : i32
    %c0_i32_1 = arith.constant 0 : i32
    return %c0_i32, %c0_i32_0 : i32, i32
  }
  func.func @transform_3(%arg0: i32) -> (i32, i32) {
    %c0_i32 = arith.constant 0 : i32
    %c0_i32_0 = arith.constant 0 : i32
    %c0_i32_1 = arith.constant 0 : i32
    return %c0_i32, %c0_i32_0 : i32, i32
  }
  func.func @transform_4(%arg0: i32) -> (i32, i32) {
    %c0_i32 = arith.constant 0 : i32
    %c0_i32_0 = arith.constant 0 : i32
    %c0_i32_1 = arith.constant 0 : i32
    return %c0_i32, %c0_i32_0 : i32, i32
  }
  func.func @transform_5(%arg0: i32) -> (i32, i32) {
    %c0_i32 = arith.constant 0 : i32
    %c0_i32_0 = arith.constant 0 : i32
    return %arg0, %c0_i32 : i32, i32
  }
}

</mosaic_0001>

<bundles_post_ra>
// kernel: tpu_custom_call.1
= control target key start
LH: loop header
LB: loop body
LE: loop exit
PB: predicated region body
PF: predicated region fallthrough
CT: control target
= control target key end

     0   :  { %10 = vsyncpa [#allocation3], 0  ;;  %s525_s0 = inlined_call_operand.hbm [shape: f32[16,128], index: 0, kind: input, shape index: {}]   ;;  %s526_s1 = inlined_call_operand.hbm [shape: f32[128,256], index: 1, kind: input, shape index: {}]   ;;  %s527_s2 = inlined_call_operand.vmem [shape: f32[1,256], index: 2, kind: input, shape index: {}]   ;;  %s528_s3 = inlined_call_operand.hbm [shape: f32[256,128], index: 3, kind: input, shape index: {}]   ;;  %s529_s4 = inlined_call_operand.vmem [shape: f32[1,128], index: 4, kind: input, shape index: {}]   ;;  %s530_s5 = inlined_call_operand.hbm [shape: f32[16,128], index: 5, kind: output, shape index: {}]  }
   0x1   :  { %11 = vsyncpa [#allocation6], 0 }
   0x2   :  { %12 = vsyncpa [#allocation4], 0  ;;  %s457_s18 = smov [#allocation5]  }
   0x3   :  { %s30_s19 = sshll.u32 %s457_s18, 4  ;;  %s31_s19 = int_to_ptr.vmem [resolvable:$true] %s30_s19 }
   0x4   :  { %s379_s20 = scalar_lea.vmem %s31_s19, 4096  ;;  %p384_p1 = scmp.lt.s32.totalorder %s31_s19, %s31_s19 }
   0x5   :  { %p380_p0 = scmp.ne.s32.totalorder %s31_s19, %s379_s20  ;;  %p385_p2 = scmp.lt.s32.totalorder %s379_s20, %s379_s20 }
   0x7   :  { %p386_p3 = por %p385_p2, %p384_p1 }
   0x9   :  { %p387_p4 = pnand %p386_p3, %p380_p0 }
   0xb   :  { %390 = shalt.err (!%p387_p4)
}
   0xc   :  { %s458_s21 = smov 256   ;;  %s459_s22 = smov 16  }
   0xd   :  { %36 = dma.hbm_to_vmem [thread:$0]  %s526_s1, 4096, %s31_s19, [#allocation6], %s458_s21, %s458_s21, %s459_s22  }
   0xe   :  { %s460_s25 = smov [#allocation2]  }
   0xf   :  { %s18_s26 = sshll.u32 %s460_s25, 4  ;;  %s19_s26 = int_to_ptr.vmem [resolvable:$true] %s18_s26 }
  0x10   :  { %s399_s27 = scalar_lea.vmem %s19_s26, 256  ;;  %p404_p6 = scmp.lt.s32.totalorder %s19_s26, %s19_s26 }
  0x11   :  { %p400_p5 = scmp.ne.s32.totalorder %s19_s26, %s399_s27  ;;  %p405_p7 = scmp.lt.s32.totalorder %s399_s27, %s399_s27 }
  0x13   :  { %p406_p8 = por %p405_p7, %p404_p6 }
  0x15   :  { %p407_p9 = pnand %p406_p8, %p400_p5 }
  0x17   :  { %410 = shalt.err (!%p407_p9)
}
  0x18   :  { %s461_s28 = smov 128   ;;  %s462_s29 = smov 8  }
  0x19   :  { %24 = dma.hbm_to_vmem [thread:$0]  %s525_s0, 256, %s19_s26, [#allocation3], %s461_s28, %s461_s28, %s462_s29  }
  0x1a   :  { %s463_s1 = smov [#allocation7]  }
  0x1b   :  { %s44_s7 = sshll.u32 %s463_s1, 4  ;;  %s45_s7 = int_to_ptr.vmem [resolvable:$true] %s44_s7 }
  0x1c   :  { %s419_s8 = scalar_lea.vmem %s45_s7, 4096  ;;  %p424_p11 = scmp.lt.s32.totalorder %s45_s7, %s45_s7 }
  0x1d   :  { %p420_p10 = scmp.ne.s32.totalorder %s45_s7, %s419_s8  ;;  %p425_p12 = scmp.lt.s32.totalorder %s419_s8, %s419_s8 }
  0x1f   :  { %p426_p13 = por %p425_p12, %p424_p11 }
  0x21   :  { %p427_p0 = pnand %p426_p13, %p420_p10 }
  0x23   :  { %430 = shalt.err (!%p427_p0)
}
  0x24   :  { %50 = dma.hbm_to_vmem [thread:$0]  %s528_s3, 4096, %s45_s7, [#allocation6], %s461_s28, %s461_s28, %s462_s29  }
  0x25   :  { %451 = dma.done.wait [#allocation3], 256  }
  0x26   :  { %452 = vsyncadd [#allocation3], 4294967040 }
  0x27   :  { %453 = dma.done.wait [#allocation6], 8192  }
  0x28   :  { %454 = vsyncadd [#allocation6], 4294959104  ;;  %v464_v0 = vmov 0.0   ;;  %v95_v1 = vld [vmem:[#allocation5 + $0xf8] sm:$0xff]  ;;  %v94_v2 = vld [vmem:[#allocation5 + $0xf0] sm:$0xff]  ;;  %s465_s12 = smov [#allocation8]  }
  0x29   :  { %172 = vmatprep.mubr.f32.mxu0 %v464_v0  ;;  %v93_v3 = vld [vmem:[#allocation5 + $0xe8] sm:$0xff]  ;;  %108 = vmatprep.subr.mxu0 %v95_v1  ;;  %v92_v4 = vld [vmem:[#allocation5 + $0xe0] sm:$0xff]  ;;  %v91_v5 = vld [vmem:[#allocation5 + $0xd8] sm:$0xff]  ;;  %s310_s13 = sshll.u32 %s465_s12, 4  ;;  %s311_s13 = int_to_ptr.vmem [resolvable:$true] %s310_s13 }
  0x2a   :  { %109 = vmatpush1.msra.mxu0 %v94_v2  ;;  %v90_v6 = vld [vmem:[#allocation5 + $0xd0] sm:$0xff]  ;;  %v89_v7 = vld [vmem:[#allocation5 + $0xc8] sm:$0xff]  ;;  %v88_v8 = vld [vmem:[#allocation5 + $0xc0] sm:$0xff]  ;;  %s431_s14 = scalar_lea.vmem %s311_s13, 256  ;;  %p436_p2 = scmp.lt.s32.totalorder %s311_s13, %s311_s13 }
  0x2b   :  { %110 = vmatprep.subr.mxu0 %v93_v3  ;;  %v87_v9 = vld [vmem:[#allocation5 + $0xb8] sm:$0xff]  ;;  %v86_v10 = vld [vmem:[#allocation5 + $0xb0] sm:$0xff]  ;;  %v85_v11 = vld [vmem:[#allocation5 + $0xa8] sm:$0xff]  ;;  %p432_p1 = scmp.ne.s32.totalorder %s311_s13, %s431_s14  ;;  %p437_p3 = scmp.lt.s32.totalorder %s431_s14, %s431_s14 }
  0x2c   :  { %111 = vmatpush1.msra.mxu0 %v92_v4  ;;  %v84_v12 = vld [vmem:[#allocation5 + $0xa0] sm:$0xff]  ;;  %v83_v13 = vld [vmem:[#allocation5 + $0x98] sm:$0xff]  ;;  %v82_v14 = vld [vmem:[#allocation5 + $0x90] sm:$0xff] }
  0x2d   :  { %112 = vmatprep.subr.mxu0 %v91_v5  ;;  %v220_v15 = vld [vmem:[#allocation7 + $0xf8] sm:$0xff]  ;;  %v81_v17 = vld [vmem:[#allocation5 + $0x88] sm:$0xff]  ;;  %v219_v18 = vld [vmem:[#allocation7 + $0xf0] sm:$0xff]  ;;  %p438_p4 = por %p437_p3, %p436_p2 }
  0x2e   :  { %113 = vmatpush1.msra.mxu0 %v90_v6  ;;  %v204_v16 = vld [vmem:[#allocation7 + $0x78] sm:$0xff]  ;;  %324 = vmatprep.subr.mxu1 %v220_v15  ;;  %v203_v19 = vld [vmem:[#allocation7 + $0x70] sm:$0xff]  ;;  %v80_v20 = vld [vmem:[#allocation5 + $0x80] sm:$0xff] }
  0x2f   :  { %114 = vmatprep.subr.mxu0 %v89_v7  ;;  %325 = vmatpush3.msra.mxu1 %v204_v16  ;;  %v218_v21 = vld [vmem:[#allocation7 + $0xe8] sm:$0xff]  ;;  %v79_v22 = vld [vmem:[#allocation5 + $0x78] sm:$0xff]  ;;  %v78_v24 = vld [vmem:[#allocation5 + $0x70] sm:$0xff]  ;;  %p439_p5 = pnand %p438_p4, %p432_p1 }
  0x30   :  { %115 = vmatpush1.msra.mxu0 %v88_v8  ;;  %326 = vmatprep.subr.mxu1 %v219_v18  ;;  %v202_v23 = vld [vmem:[#allocation7 + $0x68] sm:$0xff]  ;;  %v217_v25 = vld [vmem:[#allocation7 + $0xe0] sm:$0xff]  ;;  %v216_v29 = vld [vmem:[#allocation7 + $0xd8] sm:$0xff] }
  0x31   :  { %116 = vmatprep.subr.mxu0 %v87_v9  ;;  %327 = vmatpush3.msra.mxu1 %v203_v19  ;;  %v77_v26 = vld [vmem:[#allocation5 + $0x68] sm:$0xff]  ;;  %v201_v27 = vld [vmem:[#allocation7 + $0x60] sm:$0xff]  ;;  %v75_v30 = vld [vmem:[#allocation5 + $0x58] sm:$0xff] }
  0x32   :  { %117 = vmatpush1.msra.mxu0 %v86_v10  ;;  %328 = vmatprep.subr.mxu1 %v218_v21  ;;  %v76_v28 = vld [vmem:[#allocation5 + $0x60] sm:$0xff]  ;;  %v200_v31 = vld [vmem:[#allocation7 + $0x58] sm:$0xff]  ;;  %v74_v32 = vld [vmem:[#allocation5 + $0x50] sm:$0xff] }
  0x33   :  { %118 = vmatprep.subr.mxu0 %v85_v11  ;;  %329 = vmatpush3.msra.mxu1 %v202_v23  ;;  %v215_v33 = vld [vmem:[#allocation7 + $0xd0] sm:$0xff]  ;;  %v73_v34 = vld [vmem:[#allocation5 + $0x48] sm:$0xff]  ;;  %v72_v36 = vld [vmem:[#allocation5 + $0x40] sm:$0xff] }
  0x34   :  { %119 = vmatpush1.msra.mxu0 %v84_v12  ;;  %330 = vmatprep.subr.mxu1 %v217_v25  ;;  %v199_v35 = vld [vmem:[#allocation7 + $0x50] sm:$0xff]  ;;  %v214_v37 = vld [vmem:[#allocation7 + $0xc8] sm:$0xff]  ;;  %v71_v38 = vld [vmem:[#allocation5 + $0x38] sm:$0xff] }
  0x35   :  { %120 = vmatprep.subr.mxu0 %v83_v13  ;;  %331 = vmatpush3.msra.mxu1 %v201_v27  ;;  %v198_v39 = vld [vmem:[#allocation7 + $0x48] sm:$0xff]  ;;  %v70_v40 = vld [vmem:[#allocation5 + $0x30] sm:$0xff]  ;;  %v213_v41 = vld [vmem:[#allocation7 + $0xc0] sm:$0xff] }
  0x36   :  { %121 = vmatpush1.msra.mxu0 %v82_v14  ;;  %332 = vmatprep.subr.mxu1 %v216_v29  ;;  %v69_v42 = vld [vmem:[#allocation5 + $0x28] sm:$0xff]  ;;  %v197_v43 = vld [vmem:[#allocation7 + $0x40] sm:$0xff]  ;;  %v212_v45 = vld [vmem:[#allocation7 + $0xb8] sm:$0xff] }
  0x37   :  { %122 = vmatprep.subr.mxu0 %v81_v17  ;;  %333 = vmatpush3.msra.mxu1 %v200_v31  ;;  %v68_v44 = vld [vmem:[#allocation5 + $0x20] sm:$0xff]  ;;  %v67_v46 = vld [vmem:[#allocation5 + $0x18] sm:$0xff]  ;;  %v66_v48 = vld [vmem:[#allocation5 + $0x10] sm:$0xff] }
  0x38   :  { %123 = vmatpush1.msra.mxu0 %v80_v20  ;;  %334 = vmatprep.subr.mxu1 %v215_v33  ;;  %v196_v47 = vld [vmem:[#allocation7 + $0x38] sm:$0xff]  ;;  %v211_v49 = vld [vmem:[#allocation7 + $0xb0] sm:$0xff]  ;;  %v65_v50 = vld [vmem:[#allocation5 + $0x8] sm:$0xff] }
  0x39   :  { %124 = vmatprep.subr.mxu0 %v79_v22  ;;  %335 = vmatpush3.msra.mxu1 %v199_v35  ;;  %v195_v51 = vld [vmem:[#allocation7 + $0x30] sm:$0xff]  ;;  %v64_v52 = vld [vmem:[#allocation5] sm:$0xff]  ;;  %v210_v53 = vld [vmem:[#allocation7 + $0xa8] sm:$0xff] }
  0x3a   :  { %125 = vmatpush1.msra.mxu0 %v78_v24  ;;  %336 = vmatprep.subr.mxu1 %v214_v37  ;;  %v62_v54 = vld [vmem:[#allocation2] sm:$0xff]  ;;  %v194_v55 = vld [vmem:[#allocation7 + $0x28] sm:$0xff]  ;;  %v209_v56 = vld [vmem:[#allocation7 + $0xa0] sm:$0xff] }
  0x3b   :  { %126 = vmatprep.subr.mxu0 %v77_v26  ;;  %337 = vmatpush3.msra.mxu1 %v198_v39  ;;  %v193_v57 = vld [vmem:[#allocation7 + $0x20] sm:$0xff]  ;;  %v63_v58 = vld [vmem:[#allocation2 + $0x8] sm:$0xff]  ;;  %v207_v61 = vld [vmem:[#allocation7 + $0x90] sm:$0xff] }
  0x3c   :  { %127 = vmatpush1.msra.mxu0 %v76_v28  ;;  %338 = vmatprep.subr.mxu1 %v213_v41  ;;  %v208_v59 = vld [vmem:[#allocation7 + $0x98] sm:$0xff]  ;;  %v191_v62 = vld [vmem:[#allocation7 + $0x10] sm:$0xff]  ;;  %v206_v63 = vld [vmem:[#allocation7 + $0x88] sm:$0xff] }
  0x3d   :  { %128 = vmatprep.subr.mxu0 %v75_v30  ;;  %339 = vmatpush3.msra.mxu1 %v197_v43  ;;  %v192_v60 = vld [vmem:[#allocation7 + $0x18] sm:$0xff]  ;;  %v190_v1 = vld [vmem:[#allocation7 + $0x8] sm:$0xff]  ;;  %v205_v2 = vld [vmem:[#allocation7 + $0x80] sm:$0xff] }
  0x3e   :  { %129 = vmatpush1.msra.mxu0 %v74_v32  ;;  %340 = vmatprep.subr.mxu1 %v212_v45  ;;  %v189_v3 = vld [vmem:[#allocation7] sm:$0xff]  ;;  %v96_v6 = vld [vmem:[%s527_s2] sm:$0x3] }
  0x3f   :  { %130 = vmatprep.subr.mxu0 %v73_v34  ;;  %341 = vmatpush3.msra.mxu1 %v196_v47  ;;  %v323_v23 = vld [vmem:[%s529_s4] ss:$0 sm:$0xff] }
  0x40   :  { %131 = vmatpush1.msra.mxu0 %v72_v36  ;;  %342 = vmatprep.subr.mxu1 %v211_v49 }
  0x41   :  { %132 = vmatprep.subr.mxu0 %v71_v38  ;;  %343 = vmatpush3.msra.mxu1 %v195_v51 }
  0x42   :  { %133 = vmatpush1.msra.mxu0 %v70_v40  ;;  %344 = vmatprep.subr.mxu1 %v210_v53 }
  0x43   :  { %134 = vmatprep.subr.mxu0 %v69_v42  ;;  %345 = vmatpush3.msra.mxu1 %v194_v55 }
  0x44   :  { %135 = vmatpush1.msra.mxu0 %v68_v44  ;;  %346 = vmatprep.subr.mxu1 %v209_v56 }
  0x45   :  { %136 = vmatprep.subr.mxu0 %v67_v46  ;;  %347 = vmatpush3.msra.mxu1 %v193_v57 }
  0x46   :  { %137 = vmatpush1.msra.mxu0 %v66_v48  ;;  %348 = vmatprep.subr.mxu1 %v208_v59 }
  0x47   :  { %138 = vmatprep.subr.mxu0 %v65_v50  ;;  %349 = vmatpush3.msra.mxu1 %v192_v60 }
  0x48   :  { %139 = vmatpush1.msra.mxu0 %v64_v52  ;;  %350 = vmatprep.subr.mxu1 %v207_v61 }
  0x49   :  { %173 = vmatmul.mubr.f32.vlgmr.msra.gmra.mxu0 %v62_v54  ;;  %351 = vmatpush3.msra.mxu1 %v191_v62 }
  0x4a   :  { %178 = vmatprep.mubr.f32.mxu0 %v464_v0  ;;  %352 = vmatprep.subr.mxu1 %v206_v63  ;;  %v98_v0 = vlaneseq }
  0x4b   :  { %353 = vmatpush3.msra.mxu1 %v190_v1 }
  0x4c   :  { %354 = vmatprep.subr.mxu1 %v205_v2  ;;  %v99_v4 = vshrl.u32 %v98_v0, 7 }
  0x4d   :  { %179 = vmatmul.mubr.f32.gmra.mxu0 %v63_v58  ;;  %355 = vmatpush3.msra.mxu1 %v189_v3 }
  0x4e   :  { %v100_v5 = vsub.s32 0, %v99_v4  ;;  %v104_v7 = vsub.s32 1, %v99_v4 }
  0x50   :  { %v101_v8 = vrot.slane %v96_v6, %v100_v5  ;;  %v105_v9 = vrot.slane %v96_v6, %v104_v7 }
 0x109   :  { %v174_v10 = vpop.f32.mrf.mxu0 }
 0x10a   :  { %v175_v11 = vadd.f32 %v174_v10, %v101_v8 }
 0x10b   :  { %v176_v12 = vpop.f32.mrf.mxu0 }
 0x10c   :  { %v177_v13 = vadd.f32 %v176_v12, %v105_v9  ;;  %v185_v16 = vmax.f32 %v175_v11, 0.0 }
 0x10d   :  { %v180_v14 = vpop.f32.mrf.mxu0 }
 0x10e   :  { %v186_v15 = vmax.f32 %v177_v13, 0.0  ;;  %v181_v17 = vadd.f32 %v180_v14, %v101_v8 }
 0x10f   :  { %v182_v18 = vpop.f32.mrf.mxu0 }
 0x110   :  { %v183_v19 = vadd.f32 %v182_v18, %v105_v9  ;;  %292 = vmatprep.mubr.f32.mxu1 %v186_v15  ;;  %v187_v21 = vmax.f32 %v181_v17, 0.0 }
 0x111   :  { %293 = vmatmul.mubr.f32.vlgmr.msra.gmra.mxu1 %v185_v16 }
 0x112   :  { %v188_v20 = vmax.f32 %v183_v19, 0.0 }
 0x114   :  { %297 = vmatprep.mubr.f32.mxu1 %v188_v20 }
 0x115   :  { %298 = vmatmul.mubr.f32.gmra.mxu1 %v187_v21 }
 0x1d1   :  { %v356_v22 = vpop.f32.mrf.mxu1 }
 0x1d3   :  { %v357_v24 = vpop.f32.mrf.mxu1 }
 0x1d4   :  { %v358_v25 = vadd.f32 %v357_v24, %v356_v22 }
 0x1d5   :  { %v359_v26 = vpop.f32.mrf.mxu1 }
 0x1d6   :  { %v295_v27 = vadd.f32 %v358_v25, %v323_v23 }
 0x1d7   :  { %v360_v28 = vpop.f32.mrf.mxu1 }
 0x1d8   :  { %303 = vst [vmem:[#allocation8] sm:$0xff] %v295_v27  ;;  %v361_v29 = vadd.f32 %v360_v28, %v359_v26 }
 0x1da   :  { %v300_v30 = vadd.f32 %v361_v29, %v323_v23 }
 0x1dc   :  { %304 = vst [vmem:[#allocation8 + $0x8] sm:$0xff] %v300_v30 }
 0x1dd   :  { %442 = shalt.err (!%p439_p5)
}
 0x1de   :  { %316 = dma.vmem_to_hbm [thread:$0]  %s311_s13, 256, %s530_s5, [#allocation4], %s461_s28, %s461_s28, %s462_s29  }
 0x1df   :  { %455 = dma.done.wait [#allocation4], 256  }
 0x1e0   :  { %456 = vsyncadd [#allocation4], 4294967040 }
 0x1e1   :  { %320 = vsyncpa [#allocation3], 1 }
 0x1e2   :  { %321 = vsyncpa [#allocation6], 1 }
 0x1e3   :  { %322 = vsyncpa [#allocation4], 1 }

</bundles_post_ra>
